<compile_context>
chip_gen: v7x
topology: tpu7x:2x2x1
jax: 0.10.0
libtpu: 0.0.40
codegen_flags: <defaults>
</compile_context>

<pallas_src>
import jax
import jax.numpy as jnp
from jax.experimental import pallas as pl
from jax.experimental.pallas import tpu as pltpu

INPUT_DIM = 40
HIDDEN = 32
OUT = 1


def _round_up(x, m):
    return (x + m - 1) // m * m


def _make_kernel(tile_b, batch, mask_tail):
    def kernel(x_ref, w1_ref, b1_ref, w2_ref, b2_ref, o_ref):
        # x_ref : [tile_b, 40] f32  (streamed, double-buffered)
        # w1_ref: [40, 32]   b1_ref: [1, 32]   w2_ref: [32, 1]   b2_ref: [1, 1]
        # o_ref : [1, tile_b] f32   (lane-dense output slab)
        h = jnp.dot(x_ref[...], w1_ref[...],
                    preferred_element_type=jnp.float32)       # MXU, f32 accumulate
        h = jnp.maximum(h + b1_ref[...], 0.0)                 # [tile_b, 32], VPU
        # 32 -> 1 projection off the MXU: batch onto lanes (XLU transpose),
        # then VPU multiply + sublane reduce -> lane-dense [1, tile_b].
        ht = h.T                                              # [32, tile_b]
        y = jnp.sum(ht * w2_ref[...], axis=0, keepdims=True) + b2_ref[...]
        if mask_tail:
            col = jax.lax.broadcasted_iota(jnp.int32, (1, tile_b), 1)
            rows = pl.program_id(0) * tile_b + col
            y = jnp.where(rows < batch, y, 0.0)               # zero padded tail rows
        o_ref[...] = y.astype(o_ref.dtype)

    return kernel


def predictor_forward(x, w1, b1, w2, b2, *, tile_b=4096):
    """x: [B, 40] f32.  w1: [40, 32], b1: [32], w2: [32, 1], b2: [1]. Returns [B, 1] f32."""
    B = x.shape[0]
    assert x.shape[1] == INPUT_DIM
    x = x.astype(jnp.float32)

    # 128-row rounded tile; keep >= 2 grid steps when B allows (v7x: 2 TCs).
    tile_b = max(128, min(_round_up(tile_b, 128), _round_up(pl.cdiv(B, 2), 128)))
    n_tiles = pl.cdiv(B, tile_b)
    b_pad = n_tiles * tile_b

    w1 = w1.reshape(INPUT_DIM, HIDDEN).astype(jnp.float32)
    b1 = b1.reshape(1, HIDDEN).astype(jnp.float32)
    w2 = w2.reshape(HIDDEN, OUT).astype(jnp.float32)
    b2 = b2.reshape(1, OUT).astype(jnp.float32)

    flops = 2 * B * (INPUT_DIM * HIDDEN + HIDDEN * OUT)
    bytes_accessed = (x.size + w1.size + b1.size + w2.size + b2.size + B) * 4

    kernel = _make_kernel(tile_b, B, mask_tail=(b_pad != B))

    out = pl.pallas_call(
        kernel,
        out_shape=jax.ShapeDtypeStruct((1, b_pad), jnp.float32),
        grid_spec=pltpu.PrefetchScalarGridSpec(
            num_scalar_prefetch=0,
            grid=(n_tiles,),
            in_specs=[
                pl.BlockSpec((tile_b, INPUT_DIM), lambda i: (i, 0)),   # streamed x
                pl.BlockSpec((INPUT_DIM, HIDDEN), lambda i: (0, 0)),   # resident weights
                pl.BlockSpec((1, HIDDEN), lambda i: (0, 0)),
                pl.BlockSpec((HIDDEN, OUT), lambda i: (0, 0)),
                pl.BlockSpec((1, OUT), lambda i: (0, 0)),
            ],
            out_specs=pl.BlockSpec((1, tile_b), lambda i: (0, i)),     # lane-dense
        ),
        compiler_params=pltpu.CompilerParams(
            dimension_semantics=("parallel",),
        ),
        cost_estimate=pl.CostEstimate(
            flops=flops, transcendentals=0, bytes_accessed=bytes_accessed),
    )(x, w1, b1, w2, b2)

    # [1, b_pad] -> [b_pad, 1] is a free row-major reshape; drop the masked tail.
    return out.reshape(b_pad, OUT)[:B]


def init_params(key):
    # Mimic PyTorch nn.Linear default init (uniform +-1/sqrt(fan_in)).
    k1, k2, k3, k4 = jax.random.split(key, 4)
    lim1 = 1.0 / jnp.sqrt(jnp.float32(INPUT_DIM))
    lim2 = 1.0 / jnp.sqrt(jnp.float32(HIDDEN))
    w1 = jax.random.uniform(k1, (INPUT_DIM, HIDDEN), jnp.float32, -lim1, lim1)
    b1 = jax.random.uniform(k2, (HIDDEN,), jnp.float32, -lim1, lim1)
    w2 = jax.random.uniform(k3, (HIDDEN, OUT), jnp.float32, -lim2, lim2)
    b2 = jax.random.uniform(k4, (OUT,), jnp.float32, -lim2, lim2)
    return w1, b1, w2, b2


if __name__ == "__main__":
    key = jax.random.PRNGKey(0)
    kx, kp = jax.random.split(key)

    # Small demo batch; tile_b clamps to 128 here, exercising a 2-step grid plus
    # in-kernel tail masking (200 rows -> 2 tiles of 128).
    B = 200
    x = jax.random.normal(kx, (B, INPUT_DIM), jnp.float32)
    w1, b1, w2, b2 = init_params(kp)

    out = predictor_forward(x, w1, b1, w2, b2)
    out = jax.block_until_ready(out)
    assert out.shape == (B, OUT)

    # Pure f32 JAX reference (same math as the PyTorch Predictor forward).
    ref = jnp.maximum(x @ w1 + b1[None, :], 0.0) @ w2 + b2[None, :]
    max_err = float(jnp.max(jnp.abs(out - ref)))
    # Tolerance covers MXU f32 pass-count differences between Mosaic and XLA dots.
    assert jnp.allclose(out, ref, atol=5e-3, rtol=5e-3), max_err

    print("KERNEL_OK")
</pallas_src>

<mosaic_0001>
module attributes {stable_mosaic.version = 11 : i64} {
  func.func @kernel(%arg0: i32, %arg1: memref<128x40xf32, #tpu.memory_space<vmem>>, %arg2: memref<40x32xf32, #tpu.memory_space<vmem>>, %arg3: memref<1x32xf32, #tpu.memory_space<vmem>>, %arg4: memref<32x1xf32, #tpu.memory_space<vmem>>, %arg5: memref<1x1xf32, #tpu.memory_space<vmem>>, %arg6: memref<1x128xf32, #tpu.memory_space<vmem>>) attributes {dimension_semantics = [#tpu.dimension_semantics<parallel>], iteration_bounds = array<i64: 2>, scalar_prefetch = 0 : i64, scratch_operands = 0 : i64, tpu.core_type = #tpu.core_type<tc>, window_params = [{transform_indices = @transform_0, window_bounds = array<i64: 128, 40>}, {pipeline_mode = #tpu.pipeline_mode<synchronous>, transform_indices = @transform_1, window_bounds = array<i64: 40, 32>}, {pipeline_mode = #tpu.pipeline_mode<synchronous>, transform_indices = @transform_2, window_bounds = array<i64: 1, 32>}, {pipeline_mode = #tpu.pipeline_mode<synchronous>, transform_indices = @transform_3, window_bounds = array<i64: 32, 1>}, {pipeline_mode = #tpu.pipeline_mode<synchronous>, transform_indices = @transform_4, window_bounds = array<i64: 1, 1>}, {transform_indices = @transform_5, window_bounds = array<i64: 1, 128>}]} {
    %c0 = arith.constant 0 : index
    %c0_0 = arith.constant 0 : index
    %0 = vector.load %arg1[%c0, %c0_0] : memref<128x40xf32, #tpu.memory_space<vmem>>, vector<128x40xf32>
    %c0_1 = arith.constant 0 : index
    %c0_2 = arith.constant 0 : index
    %1 = vector.load %arg2[%c0_1, %c0_2] : memref<40x32xf32, #tpu.memory_space<vmem>>, vector<40x32xf32>
    %cst = arith.constant dense<0.000000e+00> : vector<128x32xf32>
    %2 = tpu.matmul %0, %1, %cst {dimension_numbers = #tpu.dot_dimension_numbers<[1], [0], [0], [1], [0, 0, 1, 1], [], []>} : vector<128x40xf32>, vector<40x32xf32>, vector<128x32xf32> -> vector<128x32xf32>
    %c0_3 = arith.constant 0 : index
    %c0_4 = arith.constant 0 : index
    %3 = vector.load %arg3[%c0_3, %c0_4] : memref<1x32xf32, #tpu.memory_space<vmem>>, vector<1x32xf32>
    %4 = vector.broadcast %3 : vector<1x32xf32> to vector<128x32xf32>
    %5 = arith.addf %2, %4 : vector<128x32xf32>
    %cst_5 = arith.constant 0.000000e+00 : f32
    %6 = vector.broadcast %cst_5 : f32 to vector<128x32xf32>
    %7 = arith.maximumf %5, %6 : vector<128x32xf32>
    %8 = tpu.transpose %7, [1, 0] : vector<128x32xf32> -> vector<32x128xf32>
    %c0_6 = arith.constant 0 : index
    %c0_7 = arith.constant 0 : index
    %9 = vector.load %arg4[%c0_6, %c0_7] : memref<32x1xf32, #tpu.memory_space<vmem>>, vector<32x1xf32>
    %10 = vector.broadcast %9 : vector<32x1xf32> to vector<32x128xf32>
    %11 = arith.mulf %8, %10 : vector<32x128xf32>
    %cst_8 = arith.constant dense<0.000000e+00> : vector<128xf32>
    %12 = vector.multi_reduction <add>, %11, %cst_8 [0] : vector<32x128xf32> to vector<128xf32>
    %13 = vector.shape_cast %12 : vector<128xf32> to vector<1x128xf32>
    %c0_9 = arith.constant 0 : index
    %c0_10 = arith.constant 0 : index
    %14 = vector.load %arg5[%c0_9, %c0_10] : memref<1x1xf32, #tpu.memory_space<vmem>>, vector<1x1xf32>
    %15 = vector.broadcast %14 : vector<1x1xf32> to vector<1x128xf32>
    %16 = arith.addf %13, %15 : vector<1x128xf32>
    %17 = tpu.iota {dimensions = array<i32: 1>} : vector<1x128xi32>
    %c128_i32 = arith.constant 128 : i32
    %18 = arith.muli %arg0, %c128_i32 : i32
    %19 = vector.broadcast %18 : i32 to vector<1x128xi32>
    %20 = arith.addi %19, %17 : vector<1x128xi32>
    %c200_i32 = arith.constant 200 : i32
    %21 = vector.broadcast %c200_i32 : i32 to vector<1x128xi32>
    %22 = arith.cmpi slt, %20, %21 : vector<1x128xi32>
    %cst_11 = arith.constant 0.000000e+00 : f32
    %23 = vector.broadcast %cst_11 : f32 to vector<1x128xf32>
    %24 = arith.select %22, %16, %23 : vector<1x128xi1>, vector<1x128xf32>
    %c0_12 = arith.constant 0 : index
    %c0_13 = arith.constant 0 : index
    %25 = vector.load %arg6[%c0_12, %c0_13] : memref<1x128xf32, #tpu.memory_space<vmem>>, vector<1x128xf32>
    tpu.vector_store %arg6[%c0_12, %c0_13], %24 {strides = array<i32>} : memref<1x128xf32, #tpu.memory_space<vmem>>, vector<1x128xf32>,
    return
  }
  func.func @transform_0(%arg0: i32) -> (i32, i32) {
    %c0_i32 = arith.constant 0 : i32
    %c0_i32_0 = arith.constant 0 : i32
    return %arg0, %c0_i32 : i32, i32
  }
  func.func @transform_1(%arg0: i32) -> (i32, i32) {
    %c0_i32 = arith.constant 0 : i32
    %c0_i32_0 = arith.constant 0 : i32
    %c0_i32_1 = arith.constant 0 : i32
    return %c0_i32, %c0_i32_0 : i32, i32
  }
  func.func @transform_2(%arg0: i32) -> (i32, i32) {
    %c0_i32 = arith.constant 0 : i32
    %c0_i32_0 = arith.constant 0 : i32
    %c0_i32_1 = arith.constant 0 : i32
    return %c0_i32, %c0_i32_0 : i32, i32
  }
  func.func @transform_3(%arg0: i32) -> (i32, i32) {
    %c0_i32 = arith.constant 0 : i32
    %c0_i32_0 = arith.constant 0 : i32
    %c0_i32_1 = arith.constant 0 : i32
    return %c0_i32, %c0_i32_0 : i32, i32
  }
  func.func @transform_4(%arg0: i32) -> (i32, i32) {
    %c0_i32 = arith.constant 0 : i32
    %c0_i32_0 = arith.constant 0 : i32
    %c0_i32_1 = arith.constant 0 : i32
    return %c0_i32, %c0_i32_0 : i32, i32
  }
  func.func @transform_5(%arg0: i32) -> (i32, i32) {
    %c0_i32 = arith.constant 0 : i32
    %c0_i32_0 = arith.constant 0 : i32
    return %c0_i32, %arg0 : i32, i32
  }
}

</mosaic_0001>

<bundles_post_ra>
// kernel: tpu_custom_call.1
= control target key start
LH: loop header
LB: loop body
LE: loop exit
PB: predicated region body
PF: predicated region fallthrough
CT: control target
= control target key end

     0   :  { %s1045_s0 = inlined_call_operand.vmem [shape: f32[200,40], index: 0, kind: input, shape index: {}]   ;;  %s1046_s1 = inlined_call_operand.vmem [shape: f32[40,32], index: 1, kind: input, shape index: {}]   ;;  %s1047_s2 = inlined_call_operand.vmem [shape: f32[1,32], index: 2, kind: input, shape index: {}]   ;;  %s1048_s3 = inlined_call_operand.vmem [shape: f32[32,1], index: 3, kind: input, shape index: {}]   ;;  %s1049_s4 = inlined_call_operand.<no memory space> [shape: f32[1,1], index: 4, kind: input, shape index: {}]   ;;  %s1050_s5 = inlined_call_operand.hbm [shape: f32[1,256], index: 5, kind: output, shape index: {}]  }
   0x1   :  { %v10_v0 = vstv %s1049_s4 }
   0x2   :  { %11 = vst [vmem:[#allocation2] sm:$0x1] %v10_v0 }
   0x3   :  { %12 = vsyncpa [#allocation4], 0 }
   0x4   :  { %14 = vsyncpa [#allocation4 + $0x1], 0  ;;  %s877_s20 = smov 0   ;;  %s879_s21 = smov 0  }
   0x5   :  { %s881_s22 = smov 0   ;;  %s883_s23 = smov 0  }
   0x6 LB: > { %s898_s4 = sadd.s32 4294967295, %s840_s23   ;;  %s640_s24 = sadd.s32 4294967294, %s840_s23   ;;  %s840_s23 = sphi %s883_s23, %s1056_s23   ;;  %s836_s22 = sphi %s881_s22, %s1055_s22   ;;  %s832_s21 = sphi %s879_s21, %s1054_s21   ;;  %s828_s20 = sphi %s877_s20, %s1053_s20  }
   0x7   : > { %s902_s25 = sadd.s32 1, %s840_s23   ;;  %s137_s26 = sadd.s32 1, %s836_s22 }
   0x8   : > { %s134_s27 = ssub.s32 %s840_s23, %s902_s25  ;;  %p147_p0 = scmp.ne.s32.totalorder %s836_s22, %s832_s21 }
   0x9   : > { %p135_p1 = scmp.eq.s32.totalorder %s134_s27, 0  ;;  %p148_p2 = scmp.eq.s32.totalorder %s898_s4, 1 }
   0xa   : > { %p153_p3 = scmp.ne.s32.totalorder %s832_s21, %s828_s20  ;;  %p154_p4 = scmp.eq.s32.totalorder %s640_s24, 1 }
   0xb   : > { %s913_s28 = scalar_select %p135_p1, %s836_s22, %s137_s26  }
   0xc   : > { %p915_p5 = por %p148_p2, %p147_p0  ;;  %p919_p6 = por %p154_p4, %p153_p3 }
   0xd   : > { %p643_p7 = scmp.ge.s32.totalorder %s840_s23, 1  ;;  %p201_p8 = scmp.lt.s32.totalorder %s840_s23, 3 }
   0xf   : > { %p202_p9 = pnand %p643_p7, %p201_p8 }
  0x10   : > { %v262_v1 = vld [vmem:[%s1046_s1] sm:$0xff] (!%p202_p9)  ;;  %v263_v2 = vld [vmem:[%s1046_s1 + $0x8] sm:$0xff] (!%p202_p9)  ;;  %v264_v3 = vld [vmem:[%s1046_s1 + $0x10] sm:$0xff] (!%p202_p9)  ;;  %s935_s12 = sshll.u32 (!%p202_p9), %s898_s4, 4  ;;  %v842_v6 = vmov (!%p202_p9), 0   ;;  %vm274_vm0 = vcmask (!%p202_p9), 326656  }
  0x11   : > { %205 = sbr.rel (%p202_p9) target bundleno = 421 (0x1a5), region = 40  ;;  %v722_v4 = vpack.c.bf16 (!%p202_p9), %v263_v2, %v262_v1  ;;  %v265_v5 = vld [vmem:[%s1046_s1 + $0x18] sm:$0xff] (!%p202_p9)  ;;  %p237_p10 = scmp.lt.s32.totalorder (!%p202_p9), %s935_s12, 24  ;;  %777 = vset.pattern.permute.xlu1 (!%p202_p9), %v842_v6  ;;  %v518_v7 = vld [vmem:[%s1048_s3 + $0x10] sm:$0xff] (!%p202_p9)  ;;  %776 = vset.pattern.permute.xlu0 (!%p202_p9), %v842_v6  ;;  %v266_v10 = vld [vmem:[%s1046_s1 + $0x20] sm:$0xff] (!%p202_p9) }
  0x12   : > { %v726_v8 = vpack.c.bf16 (!%p202_p9), %v265_v5, %v264_v3  ;;  %532 = vperm.xlu1 (!%p202_p9), %777, %v518_v7   ;;  %v519_v9 = vld [vmem:[%s1048_s3 + $0x18] sm:$0xff] (!%p202_p9)  ;;  %v516_v27 = vld [vmem:[%s1048_s3] sm:$0xff] (!%p202_p9)  ;;  %v517_v28 = vld [vmem:[%s1048_s3 + $0x8] sm:$0xff] (!%p202_p9)  ;;  %s663_s16 = sshll.u32 (!%p202_p9), %s898_s4, 7  ;;  %s1003_s26 = scalar_lea.hbm (!%p202_p9), %s1050_s5, %s935_s12 }
  0x13   : > { %723 = vmatprep.subr.bf16.mxu0 (!%p202_p9), %v722_v4  ;;  %730 = vmatprep.subr.bf16.mxu1 (!%p202_p9), %v722_v4  ;;  %v553_v29 = vld [vmem:[#allocation2] sm:$0x1] (!%p202_p9)  ;;  %s843_s7 = smov (!%p202_p9), [#allocation3]  }
  0x14   : > { %725 = vmatpush3.bf16.msra.mxu0 (!%p202_p9), %v722_v4  ;;  %733 = vmatpush3.bf16.msra.mxu1 (!%p202_p9), %v722_v4  ;;  %v646_v30 = vld [vmem:[%s1047_s2] ss:$0 sm:$0xff] (!%p202_p9) }
  0x15   : > { %727 = vmatprep.subr.bf16.mxu0 (!%p202_p9), %v726_v8  ;;  %731 = vmatprep.subr.bf16.mxu1 (!%p202_p9), %v726_v8 }
  0x16   : > { %537 = vperm.xlu1 (!%p202_p9), %777, %v519_v9   ;;  %522 = vperm.xlu0 (!%p202_p9), %776, %v516_v27  }
  0x18   : > { %s238_s17 = scalar_select %p237_p10, %s935_s12, 24  ;;  %729 = vmatpush3.bf16.msra.mxu0 %v726_v8  ;;  %734 = vmatpush3.bf16.msra.mxu1 %v726_v8 }
  0x19   : > { %696 = vmatprep.subr.mxu0 %v266_v10  ;;  %732 = vmatprep.subr.mxu1 %v266_v10 }
  0x1a   : > { %s645_s24 = sshll.u32 %s238_s17, 3  ;;  %527 = vperm.xlu0 %776, %v517_v28   ;;  %s230_s17 = sand.u32 1, %s832_s21  }
  0x1b   : > { %s954_s8 = scalar_lea.vmem %s1045_s0, %s645_s24  ;;  %s231_s18 = scalar_lea.vmem [#allocation3], %s230_s17 }
  0x1c   : > { %v246_v11 = vld [vmem:[%s954_s8] sm:$0xff]  ;;  %v247_v13 = vld [vmem:[%s954_s8 + $0x8] sm:$0xff]  ;;  %v248_v14 = vld [vmem:[%s954_s8 + $0x10] sm:$0xff]  ;;  %697 = vmatpush3.msra.mxu0 %v266_v10  ;;  %735 = vmatpush3.msra.mxu1 %v266_v10  ;;  %s585_s19 = sshll.u32 %s231_s18, 4  ;;  %s573_s27 = scalar_lea.sflag [#allocation4], %s230_s17  ;;  %s1005_s19 = int_to_ptr.vmem [resolvable:$true] %s585_s19 }
  0x1d   : > { %698 = vmatprep.mubr.msk.f32.mxu0 %vm274_vm0, %v246_v11  ;;  %v254_v12 = vld [vmem:[%s954_s8 + $0x40] sm:$0xff]  ;;  %v255_v15 = vld [vmem:[%s954_s8 + $0x48] sm:$0xff]  ;;  %v256_v16 = vld [vmem:[%s954_s8 + $0x50] sm:$0xff]  ;;  %s778_s6 = scalar_lea.vmem %s1005_s19, 16 }
  0x1e   : > { %710 = vmatprep.mubr.msk.f32.mxu1 %vm274_vm0, %v254_v12  ;;  %699 = vmatmul.mubr.msk.f32.vlgmr.msra.gmra.mrb[0].mxu0 %vm274_vm0, %v247_v13  ;;  %v249_v17 = vld [vmem:[%s954_s8 + $0x18] sm:$0xff]  ;;  %v250_v18 = vld [vmem:[%s954_s8 + $0x20] sm:$0xff]  ;;  %v251_v21 = vld [vmem:[%s954_s8 + $0x28] sm:$0xff]  ;;  %p779_p11 = scmp.ne.s32.totalorder %s1005_s19, %s778_s6 }
  0x1f   : > { %701 = vmatprep.mubr.msk.f32.mxu0 %vm274_vm0, %v248_v14  ;;  %711 = vmatmul.mubr.msk.f32.vlgmr.msra.gmra.mrb[0].mxu1 %vm274_vm0, %v255_v15  ;;  %v257_v19 = vld [vmem:[%s954_s8 + $0x58] sm:$0xff]  ;;  %v258_v20 = vld [vmem:[%s954_s8 + $0x60] sm:$0xff]  ;;  %v252_v22 = vld [vmem:[%s954_s8 + $0x30] sm:$0xff] }
  0x20   : > { %713 = vmatprep.mubr.msk.f32.mxu1 %vm274_vm0, %v256_v16  ;;  %v259_v23 = vld [vmem:[%s954_s8 + $0x68] sm:$0xff]  ;;  %v260_v24 = vld [vmem:[%s954_s8 + $0x70] sm:$0xff]  ;;  %v253_v25 = vld [vmem:[%s954_s8 + $0x38] sm:$0xff]  ;;  %556 = vperm.xlu0 %776, %v553_v29   ;;  %v559_v29 = vlaneseq  ;;  %p780_p12 = pnand %p779_p11, %p915_p5 }
  0x21   : > { %v261_v26 = vld [vmem:[%s954_s8 + $0x78] sm:$0xff]  ;;  %s782_s8 = sshll.u32 %s843_s7, 4  ;;  %s783_s8 = int_to_ptr.vmem [resolvable:$false] %s782_s8 }
  0x22   : > { %702 = vmatmul.mubr.msk.f32.gmra.mrb[2].mxu0 %vm274_vm0, %v249_v17  ;;  %p781_p13 = pneg %p780_p12  ;;  %s784_s9 = scalar_lea.vmem %s783_s8, 32 }
  0x23   : > { %704 = vmatprep.mubr.msk.f32.mxu0 %vm274_vm0, %v250_v18  ;;  %714 = vmatmul.mubr.msk.f32.gmra.mrb[2].mxu1 %vm274_vm0, %v257_v19  ;;  %p785_p0 = scmp.lt.s32.totalorder %s1005_s19, %s783_s8  ;;  %p786_p1 = scmp.lt.s32.totalorder %s784_s9, %s778_s6 }
  0x24   : > { %716 = vmatprep.mubr.msk.f32.mxu1 %vm274_vm0, %v258_v20 }
  0x25   : > { %p787_p2 = por %p786_p1, %p785_p0 }
  0x26   : > { %705 = vmatmul.mubr.msk.f32.gmra.mrb[4].mxu0 %vm274_vm0, %v251_v21 }
  0x27   : > { %707 = vmatprep.mubr.msk.f32.mxu0 %vm274_vm0, %v252_v22  ;;  %717 = vmatmul.mubr.msk.f32.gmra.mrb[4].mxu1 %vm274_vm0, %v259_v23  ;;  %p788_p3 = pnand %p787_p2, %p781_p13 }
  0x28   : > { %719 = vmatprep.mubr.msk.f32.mxu1 %vm274_vm0, %v260_v24 }
  0x2a   : > { %708 = vmatmul.mubr.msk.f32.gmra.mrb[6].mxu0 %vm274_vm0, %v253_v25 }
  0x2b   : > { %720 = vmatmul.mubr.msk.f32.gmra.mrb[6].mxu1 %vm274_vm0, %v261_v26 }
  0x91   : > { %v533_v15 = vpop.permute.xlu1 %532 }
  0x95   : > { %v538_v16 = vpop.permute.xlu1 %537  ;;  %v523_v17 = vpop.permute.xlu0 %522 }
  0x99   : > { %v528_v20 = vpop.permute.xlu0 %527 }
  0xf1   : > { %v700_v31 = vpop.f32.mrb[0].mxu0 }
  0xf2   : > { %v389_v32 = vpop.f32.mrb[1].mxu0  ;;  %v712_v33 = vpop.f32.mrb[0].mxu1  ;;  %v395_v36 = vadd.f32 %v700_v31, %v646_v30 }
  0xf3   : > { %v390_v34 = vadd.f32 %v646_v30, %v389_v32  ;;  %v429_v35 = vpop.f32.mrb[1].mxu1  ;;  %v435_v1 = vadd.f32 %v712_v33, %v646_v30  ;;  %v560_v32 = vshrl.u32 %v559_v29, 7 }
  0xf4   : > { %v469_v43 = vmax.f32 %v395_v36, 0.0  ;;  %v430_v62 = vadd.f32 %v646_v30, %v429_v35  ;;  %v567_v36 = vstv %s663_s16 }
  0xf5   : > { %v468_v37 = vmax.f32 %v390_v34, 0.0  ;;  %v703_v38 = vpop.f32.mrb[2].mxu0  ;;  %v477_v3 = vmax.f32 %v435_v1, 0.0  ;;  %v565_v34 = vand.u32 127, %v559_v29 }
  0xf6   : > { %v399_v39 = vpop.f32.mrb[3].mxu0  ;;  %v715_v40 = vpop.f32.mrb[2].mxu1  ;;  %v405_v49 = vadd.f32 %v703_v38, %v646_v30  ;;  %v476_v0 = vmax.f32 %v430_v62, 0.0 }
  0xf7   : > { %484 = vxpose.xlu1.b32.start [1/16] (narrow) %v468_v37, 32  ;;  %v400_v41 = vadd.f32 %v646_v30, %v399_v39  ;;  %v439_v42 = vpop.f32.mrb[3].mxu1  ;;  %v445_v5 = vadd.f32 %v715_v40, %v646_v30  ;;  %v561_v37 = vsub.s32 0, %v560_v32  ;;  %v557_v39 = vpop.permute.xlu0 %556  ;;  %v568_v40 = vadd.s32 %v567_v36, %v565_v34 }
  0xf8   : > { %v471_v55 = vmax.f32 %v405_v49, 0.0  ;;  %v440_v2 = vadd.f32 %v646_v30, %v439_v42 }
  0xf9   : > { %v706_v44 = vpop.f32.mrb[4].mxu0  ;;  %v470_v47 = vmax.f32 %v400_v41, 0.0  ;;  %v479_v7 = vmax.f32 %v445_v5, 0.0  ;;  %v562_v42 = vrot.slane %v557_v39, %v561_v37  ;;  %vm569_vm1 = vcmp.lt.s32.totalorder %v568_v40, 200 }
  0xfa   : > { %v409_v45 = vpop.f32.mrb[5].mxu0  ;;  %v718_v46 = vpop.f32.mrb[4].mxu1  ;;  %v415_v57 = vadd.f32 %v706_v44, %v646_v30  ;;  %v478_v4 = vmax.f32 %v440_v2, 0.0 }
  0xfb   : > { %485 = vxpose.xlu1.b32.cont [2/16] (narrow) %v469_v43, 32  ;;  %v449_v48 = vpop.f32.mrb[5].mxu1  ;;  %v410_v53 = vadd.f32 %v646_v30, %v409_v45  ;;  %v455_v9 = vadd.f32 %v718_v46, %v646_v30 }
  0xfc   : > { %v473_v59 = vmax.f32 %v415_v57, 0.0  ;;  %v450_v6 = vadd.f32 %v646_v30, %v449_v48 }
  0xfd   : > { %v709_v50 = vpop.f32.mrb[6].mxu0  ;;  %v472_v56 = vmax.f32 %v410_v53, 0.0  ;;  %v481_v11 = vmax.f32 %v455_v9, 0.0 }
  0xfe   : > { %v419_v51 = vpop.f32.mrb[7].mxu0  ;;  %v721_v52 = vpop.f32.mrb[6].mxu1  ;;  %v425_v61 = vadd.f32 %v709_v50, %v646_v30  ;;  %v480_v8 = vmax.f32 %v450_v6, 0.0 }
  0xff   : > { %486 = vxpose.xlu1.b32.cont [3/16] (narrow) %v470_v47, 32  ;;  %v459_v54 = vpop.f32.mrb[7].mxu1  ;;  %v420_v58 = vadd.f32 %v646_v30, %v419_v51  ;;  %v465_v13 = vadd.f32 %v721_v52, %v646_v30 }
 0x100   : > { %v475_v63 = vmax.f32 %v425_v61, 0.0  ;;  %v460_v10 = vadd.f32 %v646_v30, %v459_v54 }
 0x101   : > { %v474_v60 = vmax.f32 %v420_v58, 0.0  ;;  %v483_v14 = vmax.f32 %v465_v13, 0.0 }
 0x102   : > { %v482_v12 = vmax.f32 %v460_v10, 0.0 }
 0x103   : > { %487 = vxpose.xlu1.b32.cont [4/16] (narrow) %v471_v55, 32 }
 0x107   : > { %488 = vxpose.xlu1.b32.cont [5/16] (narrow) %v472_v56, 32 }
 0x10b   : > { %489 = vxpose.xlu1.b32.cont [6/16] (narrow) %v473_v59, 32 }
 0x10f   : > { %490 = vxpose.xlu1.b32.cont [7/16] (narrow) %v474_v60, 32 }
 0x113   : > { %491 = vxpose.xlu1.b32.cont [8/16] (narrow) %v475_v63, 32 }
 0x117   : > { %492 = vxpose.xlu1.b32.cont [9/16] (narrow) %v476_v0, 32 }
 0x11b   : > { %493 = vxpose.xlu1.b32.cont [10/16] (narrow) %v477_v3, 32 }
 0x11f   : > { %494 = vxpose.xlu1.b32.cont [11/16] (narrow) %v478_v4, 32 }
 0x123   : > { %495 = vxpose.xlu1.b32.cont [12/16] (narrow) %v479_v7, 32 }
 0x127   : > { %496 = vxpose.xlu1.b32.cont [13/16] (narrow) %v480_v8, 32 }
 0x12b   : > { %497 = vxpose.xlu1.b32.cont [14/16] (narrow) %v481_v11, 32 }
 0x12f   : > { %498 = vxpose.xlu1.b32.cont [15/16] (narrow) %v482_v12, 32 }
 0x133   : > { %499 = vxpose.xlu1.b32.end [16/16] (narrow) %v483_v14, 32 }
 0x177   : > { %v500_v18 = vpop.trf.xlu1 }
 0x178   : > { %v540_v23 = vmul.f32 %v523_v17, %v500_v18 }
 0x17b   : > { %v501_v19 = vpop.trf.xlu1 }
 0x17c   : > { %v541_v21 = vmul.f32 %v528_v20, %v501_v19 }
 0x17e   : > { %v544_v25 = vadd.f32 %v541_v21, %v540_v23 }
 0x17f   : > { %v502_v22 = vpop.trf.xlu1 }
 0x180   : > { %v542_v24 = vmul.f32 %v533_v15, %v502_v22 }
 0x182   : > { %v545_v27 = vadd.f32 %v544_v25, %v542_v24 }
 0x183   : > { %v503_v26 = vpop.trf.xlu1 }
 0x184   : > { %v543_v28 = vmul.f32 %v538_v16, %v503_v26 }
 0x186   : > { %v546_v30 = vadd.f32 %v545_v27, %v543_v28 }
 0x188   : > { %v547_v31 = vrot.slane %v546_v30, 4 }
 0x18a   : > { %v548_v33 = vadd.f32 %v547_v31, %v546_v30 }
 0x18c   : > { %v549_v35 = vrot.slane %v548_v33, 2 }
 0x18e   : > { %v550_v38 = vadd.f32 %v549_v35, %v548_v33 }
 0x190   : > { %v551_v41 = vrot.slane %v550_v38, 1 }
 0x192   : > { %v552_v43 = vadd.f32 %v551_v41, %v550_v38 }
 0x194   : > { %v563_v44 = vadd.f32 %v562_v42, %v552_v43 }
 0x196   : > { %v570_v45 = vsel %vm569_vm1, %v563_v44, 0.0 }
 0x197   : > { %571 = vst [vmem:[%s231_s18] sm:$0x1] %v570_v45 }
 0x198   : > { %791 = shalt.err (!%p788_p3)
}
 0x199   : > { %s792_s12 = scalar_lea.hbm %s1003_s26, 16  ;;  %s796_s13 = scalar_lea.hbm %s1050_s5, 32 }
 0x19a   : > { %p793_p4 = scmp.ne.s32.totalorder %s1003_s26, %s792_s12  ;;  %p797_p9 = scmp.lt.u32.totalorder %s1003_s26, %s1050_s5 }
 0x19b   : > { %p798_p10 = scmp.lt.u32.totalorder %s796_s13, %s792_s12  ;;  %p800_p12 = scmp.lt.u32.totalorder %s792_s12, %s1003_s26 }
 0x19c   : > { %p794_p7 = pnand %p793_p4, %p915_p5 }
 0x19d   : > { %p799_p11 = por %p798_p10, %p797_p9 }
 0x19e   : > { %p795_p8 = pneg %p794_p7 }
 0x19f   : > { %p801_p13 = por %p800_p12, %p799_p11 }
 0x1a1   : > { %p802_p0 = pnand %p801_p13, %p795_p8 }
 0x1a3   : > { %805 = shalt.err (!%p802_p0)
}
 0x1a4   : > { %736 = dma.vmem_to_hbm [thread:$0]  (%p915_p5), %s1005_s19, 16, %s1003_s26, %s573_s27  }
 0x1a5 PF: > { %p742_p1 = scmp.ge.s32.totalorder %s840_s23, 2  ;;  %s597_s16 = sand.u32 1, %s828_s20  }
 0x1a6   : > { %s598_s17 = scalar_lea.sflag [#allocation4], %s597_s16 }
 0x1a7   : > { %p739_p2 = pnand %p742_p1, %p919_p6 }
 0x1a9   : > { %823 = dma.done.wait (!%p739_p2), %s598_s17, 16  }
 0x1aa   : > { %825 = vsyncadd (!%p739_p2), %s598_s17, 4294967280  ;;  %p17_p3 = scmp.ge.s32.totalorder %s902_s25, 4   ;;  %s1053_s20 = smov %s832_s21 }
 0x1ab   : > { %s1054_s21 = smov %s836_s22  ;;  %s1055_s22 = smov %s913_s28 }
 0x1ac   : > { %s1056_s23 = smov %s902_s25  ;;  %19 = sbr.rel (!%p17_p3) target bundleno = 6 (0x6), region = 75 }
 0x1b3   :  { %602 = vsyncpa [#allocation4], 1 }
 0x1b4   :  { %604 = vsyncpa [#allocation4 + $0x1], 1 }

</bundles_post_ra>
